<compile_context>
chip_gen: v7x
topology: tpu7x:2x2x1
jax: 0.10.0
libtpu: 0.0.40
codegen_flags: <defaults>
</compile_context>

<pallas_src>
import jax
import jax.numpy as jnp
from jax.experimental import pallas as pl
from jax.experimental.pallas import tpu as pltpu


# ----------------------------- Pallas kernel ------------------------------- #

def _uniloss_kernel(g_ref, pos_ref, neg_ref, pts_ref, row_ref, col_ref, dis_ref):
    """Fused pairwise-sigmoid statistics + meta-point distances for one batch item.

    Row layout is p-major: row index = p*K + k (positive p of part k).

      g_ref  : (K, KN)          f32   part-selection matrix, G[k, p*K+k] = 1
      pos_ref: (1, KN, 1)       f32   predicted scores at positive pixels
      neg_ref: (1, K, NNEG)     f32   predicted scores at negative pixels
      pts_ref: (1, P, KN, NNEG) bf16  meta "points" (+-1), same row layout
      row_ref: (1, KN, 4)       f32   per-row [min_j diff, rowA, rowB+, sum_j c2]
      col_ref: (1, 2K, NNEG)    f32   per-part column sums [colA ; colB-]
      dis_ref: (1, 1, P)        f32   ||meta_point_p - c2||^2
    """
    K = neg_ref.shape[1]
    KN = pos_ref.shape[1]
    NPOS = KN // K
    P = pts_ref.shape[1]

    pos = pos_ref[0]                                      # (KN, 1)
    # sublane replicate: row p*K + k -> neg[k]
    neg = jnp.concatenate([neg_ref[0]] * NPOS, axis=0)    # (KN, NNEG)
    diff = pos - neg                                      # (KN, NNEG)
    c2 = 2.0 * jax.nn.sigmoid(diff) - 1.0                 # cur_bin * 2 - 1

    # base "point" of Nearby_sampling is the sign matrix s = bi_bin.int()*2 - 1
    s = jnp.where(diff > 0.0, 1.0, -1.0)
    tA = s - c2
    sqA = tA * tA                                         # (bi_pm1 - c2)^2
    tBp = 1.0 - c2
    sqBp = tBp * tBp                                      # (+1 - c2)^2
    tBm = 1.0 + c2
    sqBm = tBm * tBm                                      # (-1 - c2)^2

    # ---- per-row statistics (length KN) ----
    rmin = jnp.min(diff, axis=1, keepdims=True)           # accuracy: max_p rmin > 0
    rowA = jnp.sum(sqA, axis=1, keepdims=True)
    rowBp = jnp.sum(sqBp, axis=1, keepdims=True)
    rsum = jnp.sum(c2, axis=1, keepdims=True)             # for sum_loss (mean of c2)
    row_ref[0, :, 0:1] = rmin
    row_ref[0, :, 1:2] = rowA
    row_ref[0, :, 2:3] = rowBp
    row_ref[0, :, 3:4] = rsum

    # ---- per-part column sums via MXU selection matmul ----
    g = g_ref[...]                                        # (K, KN)
    colA = jnp.dot(g, sqA, preferred_element_type=jnp.float32)    # (K, NNEG)
    colBm = jnp.dot(g, sqBm, preferred_element_type=jnp.float32)  # (K, NNEG)
    col_ref[0, 0:K, :] = colA
    col_ref[0, K:2 * K, :] = colBm

    # ---- squared distances to meta points (c2 stays in vregs; pts are bf16) ----
    for p in range(P):
        d = pts_ref[0, p].astype(jnp.float32) - c2
        dis_ref[0, 0:1, p:p + 1] = jnp.sum(d * d, keepdims=True)


def uniloss_pallas(g_mat, pos_pm, neg_val, pts_bf16):
    bs, KN, _ = pos_pm.shape
    K, NNEG = neg_val.shape[1], neg_val.shape[2]
    P = pts_bf16.shape[1]

    cost = pl.CostEstimate(
        flops=bs * (KN * NNEG * 16 + 4 * K * KN * NNEG + 3 * P * KN * NNEG),
        transcendentals=bs * KN * NNEG,
        bytes_accessed=(g_mat.size * 4 + pos_pm.size * 4 + neg_val.size * 4
                        + pts_bf16.size * 2
                        + bs * (KN * 4 * 4 + 2 * K * NNEG * 4 + P * 4)),
    )
    return pl.pallas_call(
        _uniloss_kernel,
        out_shape=(
            jax.ShapeDtypeStruct((bs, KN, 4), jnp.float32),
            jax.ShapeDtypeStruct((bs, 2 * K, NNEG), jnp.float32),
            jax.ShapeDtypeStruct((bs, 1, P), jnp.float32),
        ),
        grid=(bs,),
        in_specs=[
            pl.BlockSpec((K, KN), lambda b: (0, 0)),
            pl.BlockSpec((1, KN, 1), lambda b: (b, 0, 0)),
            pl.BlockSpec((1, K, NNEG), lambda b: (b, 0, 0)),
            pl.BlockSpec((1, P, KN, NNEG), lambda b: (b, 0, 0, 0)),
        ],
        out_specs=(
            pl.BlockSpec((1, KN, 4), lambda b: (b, 0, 0)),
            pl.BlockSpec((1, 2 * K, NNEG), lambda b: (b, 0, 0)),
            pl.BlockSpec((1, 1, P), lambda b: (b, 0, 0)),
        ),
        compiler_params=pltpu.CompilerParams(dimension_semantics=("parallel",)),
        cost_estimate=cost,
    )(g_mat, pos_pm, neg_val, pts_bf16)


# --------------------------------- glue ------------------------------------ #

def uni_loss_forward(pred, bi_target, tpts, meta_points, meta_pck, key, a_points=8):
    """JAX/Pallas forward of UniLoss (training branch). Returns (loss, acc, sum_loss)."""
    del tpts  # all parts valid in this static-shape synthetic setup (see TODO above)
    bs, K, H, W = pred.shape
    N = H * W
    P_meta = meta_points.shape[1]
    NPOS = int(meta_points.shape[3])
    NNEG = N - NPOS
    KN = K * NPOS

    pred_flat = pred.reshape(bs, K, N).astype(jnp.float32)
    tgt_flat = bi_target.reshape(bs, K, N).astype(jnp.int32)

    # positive / negative indices in ascending order (stable argsort), mirroring the
    # boolean-mask gathers in the PyTorch code.
    order = jnp.argsort(1 - tgt_flat, axis=-1)
    pos_val = jnp.take_along_axis(pred_flat, order[..., :NPOS], axis=-1)   # (bs,K,NPOS)
    neg_val = jnp.take_along_axis(pred_flat, order[..., NPOS:], axis=-1)   # (bs,K,NNEG)

    # p-major row layout (row = p*K + k) keeps the kernel tensors sublane-dense.
    pos_pm = jnp.transpose(pos_val, (0, 2, 1)).reshape(bs, KN, 1)
    pts_pm = jnp.transpose(meta_points, (0, 1, 3, 2, 4)).reshape(bs, P_meta, KN, NNEG)
    pts_bf16 = pts_pm.astype(jnp.bfloat16)   # +-1 is exact in bf16; halves DMA bytes

    # part-selection matrix for the in-kernel per-part column sums
    g_mat = (jnp.arange(KN)[None, :] % K == jnp.arange(K)[:, None]).astype(jnp.float32)

    row_stats, col_stats, dis_meta = uniloss_pallas(g_mat, pos_pm, neg_val, pts_bf16)

    rmin = row_stats[..., 0].reshape(bs, NPOS, K)
    rowA = row_stats[..., 1].reshape(bs, NPOS, K)
    rowBp = row_stats[..., 2].reshape(bs, NPOS, K)
    rsum = row_stats[..., 3]                         # (bs, KN)
    colA = col_stats[:, :K, :]                       # (bs, K, NNEG)
    colBm = col_stats[:, K:, :]                      # (bs, K, NNEG)

    # accuracy: strict '>' matches torch's `cur_bin > 0.5` (ties count as incorrect)
    part_ok = (jnp.max(rmin, axis=1) > 0.0).astype(jnp.float32)   # (bs, K)
    acc_per_item = jnp.mean(part_ok, axis=1)
    acc = jnp.mean(acc_per_item)

    # sum_loss: the torch loop overwrites sum_loss, so only the LAST item counts.
    sum_loss = jnp.sum(rsum[-1]) / (KN * NNEG)

    # distance of the unmodified base point: ||bi_pm1 - c2||^2
    dist_base = jnp.sum(rowA, axis=(1, 2))                        # (bs,)

    def per_item(key_i, rowA_i, rowBp_i, colA_i, colBm_i, dbase_i, acc_i,
                 dis_meta_i, pck_meta_i):
        # Nearby_sampling via rank-1 corrections: each sampled point differs from the
        # base sign matrix by one all(+1) row or one all(-1) column per part, so
        # dist = dist_base - removed_row/col_sum + forced_row/col_sum.
        k1, k2, kp = jax.random.split(key_i, 3)
        r1 = jax.random.randint(k1, (a_points, K), 0, NPOS)       # forced +1 rows
        r2 = jax.random.randint(k2, (a_points, K), 0, NNEG)       # forced -1 cols
        gA = jnp.take_along_axis(rowA_i, r1, axis=0)              # (a_points, K)
        gBp = jnp.take_along_axis(rowBp_i, r1, axis=0)
        dis_pos = dbase_i + jnp.sum(gBp - gA, axis=1)             # (a_points,)
        cA = jnp.take_along_axis(colA_i, r2.T, axis=1)            # (K, a_points)
        cBm = jnp.take_along_axis(colBm_i, r2.T, axis=1)
        dis_neg = dbase_i + jnp.sum(cBm - cA, axis=0)             # (a_points,)
        # pck of nearby points is analytic: +1-row point -> 1, -1-col point -> 0,
        # unmodified base point -> per-item accuracy.
        a_dis = jnp.concatenate([dis_pos, dis_neg, dbase_i[None]])
        a_pck = jnp.concatenate([jnp.ones((a_points,), jnp.float32),
                                 jnp.zeros((a_points,), jnp.float32),
                                 acc_i[None]])
        dis_all = jnp.concatenate([dis_meta_i, a_dis])
        pck_all = jnp.concatenate([pck_meta_i, a_pck])
        perm = jax.random.permutation(kp, dis_all.shape[0])       # torch.randperm
        return dis_all[perm], pck_all[perm]

    keys = jax.random.split(key, bs)
    dis_per_item, pck_per_item = jax.vmap(per_item)(
        keys, rowA, rowBp, colA, colBm, dist_base, acc_per_item,
        dis_meta[:, 0, :], meta_pck.astype(jnp.float32))

    pck = jnp.sum(pck_per_item, axis=0) / bs
    dis = jnp.sqrt(jnp.sum(dis_per_item, axis=0)) + 1e-8
    wei = 1.0 / dis
    loss_elem = jnp.sum(wei * pck) / jnp.sum(wei) * bs
    loss = -loss_elem / bs
    return loss, acc, sum_loss


# --------------------------------- main ------------------------------------ #

if __name__ == "__main__":
    bs, K, H, W = 2, 4, 16, 16        # NCHW pred, imgsize = 16
    NPOS = 4                          # positives per part (fixed, static)
    P_meta = 4                        # number of meta['points'] entries
    a_points = 8
    N = H * W
    NNEG = N - NPOS

    key = jax.random.PRNGKey(0)
    k_pred, k_pos, k_tpts, k_mpts, k_mpck, k_samp = jax.random.split(key, 6)

    pred = jax.random.normal(k_pred, (bs, K, H, W), dtype=jnp.float32)

    # binary target with exactly NPOS positive pixels per (batch, part)
    pos_positions = jax.vmap(
        lambda k: jax.random.choice(k, N, shape=(NPOS,), replace=False)
    )(jax.random.split(k_pos, bs * K)).reshape(bs, K, NPOS)
    bi_target = jnp.zeros((bs, K, N), dtype=jnp.int32)
    bi_target = jax.vmap(jax.vmap(lambda t, p: t.at[p].set(1)))(bi_target, pos_positions)
    bi_target = bi_target.reshape(bs, K, H, W)

    # target keypoints, all > 1 so every part passes c_idx
    tpts = jax.random.uniform(k_tpts, (bs, K, 2), minval=2.0, maxval=float(H))

    # meta['points'] / meta['pck'] analogues (+-1 point configurations)
    meta_points = jnp.where(
        jax.random.bernoulli(k_mpts, 0.5, (bs, P_meta, K, NPOS, NNEG)), 1.0, -1.0
    ).astype(jnp.float32)
    meta_pck = jax.random.uniform(k_mpck, (bs, P_meta), dtype=jnp.float32)

    fwd = jax.jit(uni_loss_forward, static_argnames=("a_points",))
    loss, acc, sum_loss = fwd(
        pred, bi_target, tpts, meta_points, meta_pck, k_samp, a_points=a_points)
    jax.block_until_ready((loss, acc, sum_loss))
    print("KERNEL_OK")
</pallas_src>

<mosaic_0001>
module attributes {stable_mosaic.version = 11 : i64} {
  func.func private @main(%arg0: i32) attributes {dimension_semantics = [#tpu.dimension_semantics<core_parallel>], iteration_bounds = array<i64: 2>, tpu.core_type = #tpu.core_type<sc_scalar_subcore>, window_params = []} {
    return
  }
}

module attributes {stable_mosaic.version = 11 : i64} {
  func.func private @main(%arg0: i32) attributes {dimension_semantics = [#tpu.dimension_semantics<core_parallel>], iteration_bounds = array<i64: 2>, tpu.core_type = #tpu.core_type<sc_scalar_subcore>, window_params = []} {
    return
  }
}

module attributes {stable_mosaic.version = 11 : i64} {
  func.func @_uniloss_kernel(%arg0: i32, %arg1: memref<4x16xf32, #tpu.memory_space<vmem>>, %arg2: memref<1x16x1xf32, #tpu.memory_space<vmem>>, %arg3: memref<1x4x252xf32, #tpu.memory_space<vmem>>, %arg4: memref<1x4x16x252xbf16, #tpu.memory_space<vmem>>, %arg5: memref<1x16x4xf32, #tpu.memory_space<vmem>>, %arg6: memref<1x8x252xf32, #tpu.memory_space<vmem>>, %arg7: memref<1x1x4xf32, #tpu.memory_space<vmem>>) attributes {dimension_semantics = [#tpu.dimension_semantics<parallel>], iteration_bounds = array<i64: 2>, scalar_prefetch = 0 : i64, scratch_operands = 0 : i64, tpu.core_type = #tpu.core_type<tc>, window_params = [{pipeline_mode = #tpu.pipeline_mode<synchronous>, transform_indices = @transform_0, window_bounds = array<i64: 4, 16>}, {transform_indices = @transform_1, window_bounds = array<i64: 1, 16, 1>}, {transform_indices = @transform_2, window_bounds = array<i64: 1, 4, 252>}, {transform_indices = @transform_3, window_bounds = array<i64: 1, 4, 16, 252>}, {transform_indices = @transform_4, window_bounds = array<i64: 1, 16, 4>}, {transform_indices = @transform_5, window_bounds = array<i64: 1, 8, 252>}, {transform_indices = @transform_6, window_bounds = array<i64: 1, 1, 4>}]} {
    %c0 = arith.constant 0 : index
    %c0_0 = arith.constant 0 : index
    %c0_1 = arith.constant 0 : index
    %0 = vector.load %arg2[%c0, %c0_0, %c0_1] : memref<1x16x1xf32, #tpu.memory_space<vmem>>, vector<1x16x1xf32>
    %1 = vector.shape_cast %0 : vector<1x16x1xf32> to vector<16x1xf32>
    %c0_2 = arith.constant 0 : index
    %c0_3 = arith.constant 0 : index
    %c0_4 = arith.constant 0 : index
    %2 = vector.load %arg3[%c0_2, %c0_3, %c0_4] : memref<1x4x252xf32, #tpu.memory_space<vmem>>, vector<1x4x252xf32>
    %3 = vector.shape_cast %2 : vector<1x4x252xf32> to vector<4x252xf32>
    %4 = tpu.concatenate %3, %3, %3, %3 in 0 : vector<4x252xf32>, vector<4x252xf32>, vector<4x252xf32>, vector<4x252xf32> -> vector<16x252xf32>
    %5 = vector.broadcast %1 : vector<16x1xf32> to vector<16x252xf32>
    %6 = arith.subf %5, %4 : vector<16x252xf32>
    %7 = arith.negf %6 : vector<16x252xf32>
    %8 = math.exp %7 : vector<16x252xf32>
    %cst = arith.constant 1.000000e+00 : f32
    %9 = vector.broadcast %cst : f32 to vector<16x252xf32>
    %10 = arith.addf %9, %8 : vector<16x252xf32>
    %11 = arith.divf %9, %10 : vector<16x252xf32>
    %cst_5 = arith.constant 2.000000e+00 : f32
    %12 = vector.broadcast %cst_5 : f32 to vector<16x252xf32>
    %13 = arith.mulf %12, %11 : vector<16x252xf32>
    %cst_6 = arith.constant 1.000000e+00 : f32
    %14 = vector.broadcast %cst_6 : f32 to vector<16x252xf32>
    %15 = arith.subf %13, %14 : vector<16x252xf32>
    %cst_7 = arith.constant 0.000000e+00 : f32
    %16 = vector.broadcast %cst_7 : f32 to vector<16x252xf32>
    %17 = arith.cmpf ogt, %6, %16 : vector<16x252xf32>
    %cst_8 = arith.constant 1.000000e+00 : f32
    %cst_9 = arith.constant -1.000000e+00 : f32
    %18 = vector.broadcast %cst_8 : f32 to vector<16x252xf32>
    %19 = vector.broadcast %cst_9 : f32 to vector<16x252xf32>
    %20 = arith.select %17, %18, %19 : vector<16x252xi1>, vector<16x252xf32>
    %21 = arith.subf %20, %15 : vector<16x252xf32>
    %22 = arith.mulf %21, %21 : vector<16x252xf32>
    %cst_10 = arith.constant 1.000000e+00 : f32
    %23 = vector.broadcast %cst_10 : f32 to vector<16x252xf32>
    %24 = arith.subf %23, %15 : vector<16x252xf32>
    %25 = arith.mulf %24, %24 : vector<16x252xf32>
    %cst_11 = arith.constant 1.000000e+00 : f32
    %26 = vector.broadcast %cst_11 : f32 to vector<16x252xf32>
    %27 = arith.addf %26, %15 : vector<16x252xf32>
    %28 = arith.mulf %27, %27 : vector<16x252xf32>
    %cst_12 = arith.constant dense<0x7F800000> : vector<16xf32>
    %29 = vector.multi_reduction <minimumf>, %6, %cst_12 [1] : vector<16x252xf32> to vector<16xf32>
    %30 = vector.shape_cast %29 : vector<16xf32> to vector<16x1xf32>
    %cst_13 = arith.constant dense<0.000000e+00> : vector<16xf32>
    %31 = vector.multi_reduction <add>, %22, %cst_13 [1] : vector<16x252xf32> to vector<16xf32>
    %32 = vector.shape_cast %31 : vector<16xf32> to vector<16x1xf32>
    %cst_14 = arith.constant dense<0.000000e+00> : vector<16xf32>
    %33 = vector.multi_reduction <add>, %25, %cst_14 [1] : vector<16x252xf32> to vector<16xf32>
    %34 = vector.shape_cast %33 : vector<16xf32> to vector<16x1xf32>
    %cst_15 = arith.constant dense<0.000000e+00> : vector<16xf32>
    %35 = vector.multi_reduction <add>, %15, %cst_15 [1] : vector<16x252xf32> to vector<16xf32>
    %36 = vector.shape_cast %35 : vector<16xf32> to vector<16x1xf32>
    %c0_16 = arith.constant 0 : index
    %c0_17 = arith.constant 0 : index
    %c0_18 = arith.constant 0 : index
    %37 = vector.load %arg5[%c0_16, %c0_17, %c0_18] : memref<1x16x4xf32, #tpu.memory_space<vmem>>, vector<1x16x1xf32>
    %38 = vector.shape_cast %37 : vector<1x16x1xf32> to vector<16x1xf32>
    %39 = vector.shape_cast %30 : vector<16x1xf32> to vector<1x16x1xf32>
    tpu.vector_store %arg5[%c0_16, %c0_17, %c0_18], %39 {strides = array<i32>} : memref<1x16x4xf32, #tpu.memory_space<vmem>>, vector<1x16x1xf32>,
    %c0_19 = arith.constant 0 : index
    %c0_20 = arith.constant 0 : index
    %c1 = arith.constant 1 : index
    %40 = vector.load %arg5[%c0_19, %c0_20, %c1] : memref<1x16x4xf32, #tpu.memory_space<vmem>>, vector<1x16x1xf32>
    %41 = vector.shape_cast %40 : vector<1x16x1xf32> to vector<16x1xf32>
    %42 = vector.shape_cast %32 : vector<16x1xf32> to vector<1x16x1xf32>
    tpu.vector_store %arg5[%c0_19, %c0_20, %c1], %42 {strides = array<i32>} : memref<1x16x4xf32, #tpu.memory_space<vmem>>, vector<1x16x1xf32>,
    %c0_21 = arith.constant 0 : index
    %c0_22 = arith.constant 0 : index
    %c2 = arith.constant 2 : index
    %43 = vector.load %arg5[%c0_21, %c0_22, %c2] : memref<1x16x4xf32, #tpu.memory_space<vmem>>, vector<1x16x1xf32>
    %44 = vector.shape_cast %43 : vector<1x16x1xf32> to vector<16x1xf32>
    %45 = vector.shape_cast %34 : vector<16x1xf32> to vector<1x16x1xf32>
    tpu.vector_store %arg5[%c0_21, %c0_22, %c2], %45 {strides = array<i32>} : memref<1x16x4xf32, #tpu.memory_space<vmem>>, vector<1x16x1xf32>,
    %c0_23 = arith.constant 0 : index
    %c0_24 = arith.constant 0 : index
    %c3 = arith.constant 3 : index
    %46 = vector.load %arg5[%c0_23, %c0_24, %c3] : memref<1x16x4xf32, #tpu.memory_space<vmem>>, vector<1x16x1xf32>
    %47 = vector.shape_cast %46 : vector<1x16x1xf32> to vector<16x1xf32>
    %48 = vector.shape_cast %36 : vector<16x1xf32> to vector<1x16x1xf32>
    tpu.vector_store %arg5[%c0_23, %c0_24, %c3], %48 {strides = array<i32>} : memref<1x16x4xf32, #tpu.memory_space<vmem>>, vector<1x16x1xf32>,
    %c0_25 = arith.constant 0 : index
    %c0_26 = arith.constant 0 : index
    %49 = vector.load %arg1[%c0_25, %c0_26] : memref<4x16xf32, #tpu.memory_space<vmem>>, vector<4x16xf32>
    %cst_27 = arith.constant dense<0.000000e+00> : vector<4x252xf32>
    %50 = tpu.matmul %49, %22, %cst_27 {dimension_numbers = #tpu.dot_dimension_numbers<[1], [0], [0], [1], [0, 0, 1, 1], [], []>} : vector<4x16xf32>, vector<16x252xf32>, vector<4x252xf32> -> vector<4x252xf32>
    %cst_28 = arith.constant dense<0.000000e+00> : vector<4x252xf32>
    %51 = tpu.matmul %49, %28, %cst_28 {dimension_numbers = #tpu.dot_dimension_numbers<[1], [0], [0], [1], [0, 0, 1, 1], [], []>} : vector<4x16xf32>, vector<16x252xf32>, vector<4x252xf32> -> vector<4x252xf32>
    %c0_29 = arith.constant 0 : index
    %c0_30 = arith.constant 0 : index
    %c0_31 = arith.constant 0 : index
    %52 = vector.load %arg6[%c0_29, %c0_30, %c0_31] : memref<1x8x252xf32, #tpu.memory_space<vmem>>, vector<1x4x252xf32>
    %53 = vector.shape_cast %52 : vector<1x4x252xf32> to vector<4x252xf32>
    %54 = vector.shape_cast %50 : vector<4x252xf32> to vector<1x4x252xf32>
    tpu.vector_store %arg6[%c0_29, %c0_30, %c0_31], %54 {strides = array<i32>} : memref<1x8x252xf32, #tpu.memory_space<vmem>>, vector<1x4x252xf32>,
    %c0_32 = arith.constant 0 : index
    %c4 = arith.constant 4 : index
    %c0_33 = arith.constant 0 : index
    %55 = vector.load %arg6[%c0_32, %c4, %c0_33] : memref<1x8x252xf32, #tpu.memory_space<vmem>>, vector<1x4x252xf32>
    %56 = vector.shape_cast %55 : vector<1x4x252xf32> to vector<4x252xf32>
    %57 = vector.shape_cast %51 : vector<4x252xf32> to vector<1x4x252xf32>
    tpu.vector_store %arg6[%c0_32, %c4, %c0_33], %57 {strides = array<i32>} : memref<1x8x252xf32, #tpu.memory_space<vmem>>, vector<1x4x252xf32>,
    %c0_34 = arith.constant 0 : index
    %c0_35 = arith.constant 0 : index
    %c0_36 = arith.constant 0 : index
    %c0_37 = arith.constant 0 : index
    %58 = vector.load %arg4[%c0_34, %c0_35, %c0_36, %c0_37] : memref<1x4x16x252xbf16, #tpu.memory_space<vmem>>, vector<1x1x16x252xbf16>
    %59 = vector.shape_cast %58 : vector<1x1x16x252xbf16> to vector<16x252xbf16>
    %60 = arith.extf %59 : vector<16x252xbf16> to vector<16x252xf32>
    %61 = arith.subf %60, %15 : vector<16x252xf32>
    %62 = arith.mulf %61, %61 : vector<16x252xf32>
    %63 = vector.shape_cast %62 : vector<16x252xf32> to vector<1x16x252xf32>
    %cst_38 = arith.constant dense<0.000000e+00> : vector<1xf32>
    %64 = vector.multi_reduction <add>, %63, %cst_38 [1, 2] : vector<1x16x252xf32> to vector<1xf32>
    %65 = vector.shape_cast %64 : vector<1xf32> to vector<1x1x1xf32>
    %66 = vector.extract %65[0, 0, 0] : f32 from vector<1x1x1xf32>
    %67 = vector.broadcast %66 : f32 to vector<1x1xf32>
    %c0_39 = arith.constant 0 : index
    %c0_40 = arith.constant 0 : index
    %c0_41 = arith.constant 0 : index
    %68 = vector.load %arg7[%c0_39, %c0_40, %c0_41] : memref<1x1x4xf32, #tpu.memory_space<vmem>>, vector<1x1x1xf32>
    %69 = vector.shape_cast %68 : vector<1x1x1xf32> to vector<1x1xf32>
    %70 = vector.shape_cast %67 : vector<1x1xf32> to vector<1x1x1xf32>
    tpu.vector_store %arg7[%c0_39, %c0_40, %c0_41], %70 {strides = array<i32>} : memref<1x1x4xf32, #tpu.memory_space<vmem>>, vector<1x1x1xf32>,
    %c0_42 = arith.constant 0 : index
    %c1_43 = arith.constant 1 : index
    %c0_44 = arith.constant 0 : index
    %c0_45 = arith.constant 0 : index
    %71 = vector.load %arg4[%c0_42, %c1_43, %c0_44, %c0_45] : memref<1x4x16x252xbf16, #tpu.memory_space<vmem>>, vector<1x1x16x252xbf16>
    %72 = vector.shape_cast %71 : vector<1x1x16x252xbf16> to vector<16x252xbf16>
    %73 = arith.extf %72 : vector<16x252xbf16> to vector<16x252xf32>
    %74 = arith.subf %73, %15 : vector<16x252xf32>
    %75 = arith.mulf %74, %74 : vector<16x252xf32>
    %76 = vector.shape_cast %75 : vector<16x252xf32> to vector<1x16x252xf32>
    %cst_46 = arith.constant dense<0.000000e+00> : vector<1xf32>
    %77 = vector.multi_reduction <add>, %76, %cst_46 [1, 2] : vector<1x16x252xf32> to vector<1xf32>
    %78 = vector.shape_cast %77 : vector<1xf32> to vector<1x1x1xf32>
    %79 = vector.extract %78[0, 0, 0] : f32 from vector<1x1x1xf32>
    %80 = vector.broadcast %79 : f32 to vector<1x1xf32>
    %c0_47 = arith.constant 0 : index
    %c0_48 = arith.constant 0 : index
    %c1_49 = arith.constant 1 : index
    %81 = vector.load %arg7[%c0_47, %c0_48, %c1_49] : memref<1x1x4xf32, #tpu.memory_space<vmem>>, vector<1x1x1xf32>
    %82 = vector.shape_cast %81 : vector<1x1x1xf32> to vector<1x1xf32>
    %83 = vector.shape_cast %80 : vector<1x1xf32> to vector<1x1x1xf32>
    tpu.vector_store %arg7[%c0_47, %c0_48, %c1_49], %83 {strides = array<i32>} : memref<1x1x4xf32, #tpu.memory_space<vmem>>, vector<1x1x1xf32>,
    %c0_50 = arith.constant 0 : index
    %c2_51 = arith.constant 2 : index
    %c0_52 = arith.constant 0 : index
    %c0_53 = arith.constant 0 : index
    %84 = vector.load %arg4[%c0_50, %c2_51, %c0_52, %c0_53] : memref<1x4x16x252xbf16, #tpu.memory_space<vmem>>, vector<1x1x16x252xbf16>
    %85 = vector.shape_cast %84 : vector<1x1x16x252xbf16> to vector<16x252xbf16>
    %86 = arith.extf %85 : vector<16x252xbf16> to vector<16x252xf32>
    %87 = arith.subf %86, %15 : vector<16x252xf32>
    %88 = arith.mulf %87, %87 : vector<16x252xf32>
    %89 = vector.shape_cast %88 : vector<16x252xf32> to vector<1x16x252xf32>
    %cst_54 = arith.constant dense<0.000000e+00> : vector<1xf32>
    %90 = vector.multi_reduction <add>, %89, %cst_54 [1, 2] : vector<1x16x252xf32> to vector<1xf32>
    %91 = vector.shape_cast %90 : vector<1xf32> to vector<1x1x1xf32>
    %92 = vector.extract %91[0, 0, 0] : f32 from vector<1x1x1xf32>
    %93 = vector.broadcast %92 : f32 to vector<1x1xf32>
    %c0_55 = arith.constant 0 : index
    %c0_56 = arith.constant 0 : index
    %c2_57 = arith.constant 2 : index
    %94 = vector.load %arg7[%c0_55, %c0_56, %c2_57] : memref<1x1x4xf32, #tpu.memory_space<vmem>>, vector<1x1x1xf32>
    %95 = vector.shape_cast %94 : vector<1x1x1xf32> to vector<1x1xf32>
    %96 = vector.shape_cast %93 : vector<1x1xf32> to vector<1x1x1xf32>
    tpu.vector_store %arg7[%c0_55, %c0_56, %c2_57], %96 {strides = array<i32>} : memref<1x1x4xf32, #tpu.memory_space<vmem>>, vector<1x1x1xf32>,
    %c0_58 = arith.constant 0 : index
    %c3_59 = arith.constant 3 : index
    %c0_60 = arith.constant 0 : index
    %c0_61 = arith.constant 0 : index
    %97 = vector.load %arg4[%c0_58, %c3_59, %c0_60, %c0_61] : memref<1x4x16x252xbf16, #tpu.memory_space<vmem>>, vector<1x1x16x252xbf16>
    %98 = vector.shape_cast %97 : vector<1x1x16x252xbf16> to vector<16x252xbf16>
    %99 = arith.extf %98 : vector<16x252xbf16> to vector<16x252xf32>
    %100 = arith.subf %99, %15 : vector<16x252xf32>
    %101 = arith.mulf %100, %100 : vector<16x252xf32>
    %102 = vector.shape_cast %101 : vector<16x252xf32> to vector<1x16x252xf32>
    %cst_62 = arith.constant dense<0.000000e+00> : vector<1xf32>
    %103 = vector.multi_reduction <add>, %102, %cst_62 [1, 2] : vector<1x16x252xf32> to vector<1xf32>
    %104 = vector.shape_cast %103 : vector<1xf32> to vector<1x1x1xf32>
    %105 = vector.extract %104[0, 0, 0] : f32 from vector<1x1x1xf32>
    %106 = vector.broadcast %105 : f32 to vector<1x1xf32>
    %c0_63 = arith.constant 0 : index
    %c0_64 = arith.constant 0 : index
    %c3_65 = arith.constant 3 : index
    %107 = vector.load %arg7[%c0_63, %c0_64, %c3_65] : memref<1x1x4xf32, #tpu.memory_space<vmem>>, vector<1x1x1xf32>
    %108 = vector.shape_cast %107 : vector<1x1x1xf32> to vector<1x1xf32>
    %109 = vector.shape_cast %106 : vector<1x1xf32> to vector<1x1x1xf32>
    tpu.vector_store %arg7[%c0_63, %c0_64, %c3_65], %109 {strides = array<i32>} : memref<1x1x4xf32, #tpu.memory_space<vmem>>, vector<1x1x1xf32>,
    return
  }
  func.func @transform_0(%arg0: i32) -> (i32, i32) {
    %c0_i32 = arith.constant 0 : i32
    %c0_i32_0 = arith.constant 0 : i32
    %c0_i32_1 = arith.constant 0 : i32
    return %c0_i32, %c0_i32_0 : i32, i32
  }
  func.func @transform_1(%arg0: i32) -> (i32, i32, i32) {
    %c0_i32 = arith.constant 0 : i32
    %c0_i32_0 = arith.constant 0 : i32
    %c0_i32_1 = arith.constant 0 : i32
    return %arg0, %c0_i32, %c0_i32_0 : i32, i32, i32
  }
  func.func @transform_2(%arg0: i32) -> (i32, i32, i32) {
    %c0_i32 = arith.constant 0 : i32
    %c0_i32_0 = arith.constant 0 : i32
    %c0_i32_1 = arith.constant 0 : i32
    return %arg0, %c0_i32, %c0_i32_0 : i32, i32, i32
  }
  func.func @transform_3(%arg0: i32) -> (i32, i32, i32, i32) {
    %c0_i32 = arith.constant 0 : i32
    %c0_i32_0 = arith.constant 0 : i32
    %c0_i32_1 = arith.constant 0 : i32
    %c0_i32_2 = arith.constant 0 : i32
    return %arg0, %c0_i32, %c0_i32_0, %c0_i32_1 : i32, i32, i32, i32
  }
  func.func @transform_4(%arg0: i32) -> (i32, i32, i32) {
    %c0_i32 = arith.constant 0 : i32
    %c0_i32_0 = arith.constant 0 : i32
    %c0_i32_1 = arith.constant 0 : i32
    return %arg0, %c0_i32, %c0_i32_0 : i32, i32, i32
  }
  func.func @transform_5(%arg0: i32) -> (i32, i32, i32) {
    %c0_i32 = arith.constant 0 : i32
    %c0_i32_0 = arith.constant 0 : i32
    %c0_i32_1 = arith.constant 0 : i32
    return %arg0, %c0_i32, %c0_i32_0 : i32, i32, i32
  }
  func.func @transform_6(%arg0: i32) -> (i32, i32, i32) {
    %c0_i32 = arith.constant 0 : i32
    %c0_i32_0 = arith.constant 0 : i32
    %c0_i32_1 = arith.constant 0 : i32
    return %arg0, %c0_i32, %c0_i32_0 : i32, i32, i32
  }
}

</mosaic_0001>

<bundles_post_ra>
// kernel: squeeze.27
= control target key start
LH: loop header
LB: loop body
LE: loop exit
PB: predicated region body
PF: predicated region fallthrough
CT: control target
= control target key end

     0   :  { %s43_s8 = smov 116   ;;  %vm7_vm0 = vcmask 31744   ;;  %s44_s9 = smov 120   ;;  %s64_s0 = inlined_call_operand.vmem [shape: f32[2,16], index: 0, kind: input, shape index: {}]   ;;  %s65_s1 = inlined_call_operand.vmem [shape: f32[2,4,4], index: 1, kind: output, shape index: {}]  }
   0x1   :  { %v4_v0 = vld [vmem:[%s64_s0] sm:$0x3]  ;;  %s42_s0 = smov 124  }
   0x2   :  { %5 = vst [vmem:[#allocation1] sm:$0x3] %v4_v0 }
   0x9   :  { %v9_v1 = vld [vmem:[#allocation1] sm:$0x3]  }
   0xa   :  { %v21_v2 = vld [vmem:[#allocation1] sm:$0x3]   ;;  %10 = vrot.lane.b32.xlu0 %v9_v1, %s42_s0 }
   0xb   :  { %22 = vrot.lane.b32.xlu1 %v21_v2, %s43_s8  ;;  %v6_v3 = vld [vmem:[#allocation1] sm:$0x3]  }
   0xc   :  { %v15_v4 = vld [vmem:[#allocation1] sm:$0x3]   ;;  %8 = vst.msk [vmem:[#allocation0] ss:$8 sm:$0x3] %vm7_vm0, %v6_v3  }
   0xe   :  { %16 = vrot.lane.b32.xlu0 %v15_v4, %s44_s9 }
  0x7c   :  { %v11_v5 = vpop.permute.xlu0 %10  }
  0x7d   :  { %v23_v6 = vpop.permute.xlu1 %22   ;;  %14 = vst.msk [vmem:[#allocation0 + $0x1] ss:$8 sm:$0x3] %vm7_vm0, %v11_v5  }
  0x7e   :  { %26 = vst.msk [vmem:[#allocation0 + $0x3] ss:$8 sm:$0x3] %vm7_vm0, %v23_v6  }
  0x80   :  { %v17_v7 = vpop.permute.xlu0 %16  }
  0x81   :  { %20 = vst.msk [vmem:[#allocation0 + $0x2] ss:$8 sm:$0x3] %vm7_vm0, %v17_v7  }
  0x88   :  { %v30_v8 = vld [vmem:[#allocation0] sm:$0xf]  ;;  %v34_v9 = vld [vmem:[#allocation0 + $0x8] sm:$0xf] }
  0x89   :  { %32 = vst [vmem:[%s65_s1] sm:$0xf] %v30_v8  ;;  %38 = vst [vmem:[%s65_s1 + $0x4] sm:$0xf] %v34_v9 }

// kernel: uni_loss_forward.1
= control target key start
LH: loop header
LB: loop body
LE: loop exit
PB: predicated region body
PF: predicated region fallthrough
CT: control target
= control target key end

     0   :  { %s1000_s21 = smov 0   ;;  %s1199_s0 = inlined_call_operand.vmem [shape: f32[4,16], index: 0, kind: input, shape index: {}]   ;;  %s1200_s1 = inlined_call_operand.vmem [shape: f32[2,16,1], index: 1, kind: input, shape index: {}]   ;;  %s1201_s2 = inlined_call_operand.vmem [shape: f32[2,4,252], index: 2, kind: input, shape index: {}]   ;;  %s1202_s3 = inlined_call_operand.vmem [shape: bf16[2,4,16,252], index: 3, kind: input, shape index: {}]   ;;  %s1203_s4 = inlined_call_operand.vmem [shape: f32[2,16,4], index: 4, kind: output, shape index: {0}]   ;;  %s1204_s5 = inlined_call_operand.vmem [shape: f32[2,8,252], index: 5, kind: output, shape index: {1}]   ;;  %s1205_s6 = inlined_call_operand.vmem [shape: f32[2,1,4], index: 6, kind: output, shape index: {2}]  }
   0x1 LB: > { %s870_s22 = sadd.s32 4294967295, %s960_s21   ;;  %p874_p0 = scmp.ge.s32.totalorder %s960_s21, 1  ;;  %s960_s21 = sphi %s1000_s21, %s17_s21  }
   0x2   : > { %p237_p1 = scmp.lt.s32.totalorder %s960_s21, 3 }
   0x4   : > { %p238_p2 = pnand %p874_p0, %p237_p1 }
   0x5   : > { %p285_p3 = scmp.lt.s32.totalorder (!%p238_p2), %s870_s22, 1  ;;  %v962_v0 = vmov (!%p238_p2), 0   ;;  %v963_v3 = vmov (!%p238_p2), 0.0   ;;  %vm321_vm0 = vcmask (!%p238_p2), 1043456   ;;  %vm402_vm5 = vcmask (!%p238_p2), 1014784  }
   0x6   : > { %241 = sbr.rel (%p238_p2) target bundleno = 411 (0x19b), region = 36  ;;  %935 = vset.pattern.permute.xlu0 (!%p238_p2), %v962_v0  ;;  %587 = vmatprep.mubr.f32.mxu1 (!%p238_p2), %v963_v3  ;;  %v964_v54 = vmov (!%p238_p2), -1.0   ;;  %vm448_vm6 = vcmask (!%p238_p2), 130048   ;;  %vm435_vm7 = vcmask (!%p238_p2), 7168   ;;  %vm438_vm8 = vcmask (!%p238_p2), 15368  }
   0x7   : > { %516 = vmatprep.mubr.f32.mxu0 (!%p238_p2), %v963_v3  ;;  %vm441_vm9 = vcmask (!%p238_p2), 23568   ;;  %vm444_vm10 = vcmask (!%p238_p2), 31768   ;;  %vm635_vm11 = vcmask (!%p238_p2), 0   ;;  %vm667_vm12 = vcmask (!%p238_p2), 8200  }
   0x8   : > { %vm595_vm13 = vcmask (!%p238_p2), 1010688   ;;  %vm699_vm14 = vcmask (!%p238_p2), 16400   ;;  %vm604_vm15 = vcmask (!%p238_p2), 1014788  }
   0xd   : > { %s1207_s22 = smov (!%p285_p3, %s870_s22), 1 }
   0xe   : > { %s1011_s23 = sshll.u32 %s1207_s22, 4  ;;  %s904_s27 = sshll.u32 %s1207_s22, 3 }
   0xf   : > { %s289_s26 = scalar_lea.vmem %s1200_s1, %s1011_s23  ;;  %s294_s30 = scalar_lea.vmem %s1201_s2, %s904_s27 }
  0x10   : > { %v313_v1 = vld [vmem:[%s289_s26] sm:$0xff]  ;;  %v314_v2 = vld [vmem:[%s289_s26 + $0x8] sm:$0xff]  ;;  %s905_s7 = sshll.u32 %s1207_s22, 6  ;;  %s1178_s15 = scalar_lea.vmem %s1203_s4, %s1011_s23 }
  0x11   : > { %326 = vperm.xlu0 %935, %v313_v1   ;;  %v315_v4 = vld [vmem:[%s294_s30] sm:$0xff]  ;;  %s299_s10 = scalar_lea.vmem %s1202_s3, %s905_s7  ;;  %s312_s18 = scalar_lea.vmem %s1205_s6, %s1207_s22 }
  0x12   : > { %v317_v5 = vcombine.high %v315_v4, %v315_v4  ;;  %v319_v6 = vcombine.low %v315_v4, %v315_v4  ;;  %v897_v27 = vld [vmem:[%s299_s10 + $0x20] sm:$0xff]  ;;  %v1039_v29 = vld [vmem:[%s299_s10 + $0x28] sm:$0xff]  ;;  %v1043_v31 = vld [vmem:[%s299_s10 + $0x10] sm:$0xff]  ;;  %s309_s25 = scalar_lea.vmem %s1204_s5, %s1011_s23 }
  0x13   : > { %v1037_v28 = vld [vmem:[%s299_s10] sm:$0xff]  ;;  %v1041_v30 = vld [vmem:[%s299_s10 + $0x8] sm:$0xff]  ;;  %v1045_v32 = vld [vmem:[%s299_s10 + $0x30] sm:$0xff]  ;;  %v672_v33 = vunpack.c.l.bf16 %v897_v27  ;;  %v673_v34 = vunpack.c.h.bf16 %v897_v27  ;;  %v674_v37 = vunpack.c.l.bf16 %v1039_v29  ;;  %v675_v38 = vunpack.c.h.bf16 %v1039_v29 }
  0x14   : > { %v322_v7 = vsel %vm321_vm0, %v315_v4, %v319_v6  ;;  %v323_v8 = vsel %vm321_vm0, %v317_v5, %v315_v4  ;;  %v608_v35 = vunpack.c.l.bf16 %v1037_v28  ;;  %v609_v36 = vunpack.c.h.bf16 %v1037_v28  ;;  %v1053_v41 = vld [vmem:[%s299_s10 + $0x18] sm:$0xff] }
  0x15   : > { %331 = vperm.xlu0 %935, %v314_v2   ;;  %v610_v39 = vunpack.c.l.bf16 %v1041_v30  ;;  %v611_v40 = vunpack.c.h.bf16 %v1041_v30  ;;  %v640_v43 = vunpack.c.l.bf16 %v1043_v31  ;;  %v641_v44 = vunpack.c.h.bf16 %v1043_v31  ;;  %v1058_v45 = vld [vmem:[%s299_s10 + $0x38] sm:$0xff] }
  0x16   : > { %v704_v46 = vunpack.c.l.bf16 %v1045_v32  ;;  %v642_v50 = vunpack.c.l.bf16 %v1053_v41  ;;  %v643_v51 = vunpack.c.h.bf16 %v1053_v41  ;;  %v705_v52 = vunpack.c.h.bf16 %v1045_v32 }
  0x17   : > { %v706_v56 = vunpack.c.l.bf16 %v1058_v45  ;;  %v707_v57 = vunpack.c.h.bf16 %v1058_v45  ;;  %vm731_vm0 = vcmask 24600  }
  0x90   : > { %v327_v9 = vpop.permute.xlu0 %326 }
  0x91   : > { %v1021_v10 = vsub.f32 %v327_v9, %v322_v7  ;;  %v1023_v11 = vsub.f32 %v327_v9, %v323_v8 }
  0x93   : > { %v885_v12 = vmul.f32 -1.442695, %v1021_v10  ;;  %v886_v13 = vmul.f32 -1.442695, %v1023_v11  ;;  %vm371_vm1 = vcmp.gt.f32.partialorder %v1023_v11, 0.0  ;;  %vm370_vm3 = vcmp.gt.f32.partialorder %v1021_v10, 0.0 }
  0x94   : > { %v332_v14 = vpop.permute.xlu0 %331  ;;  %v375_v55 = vsel %vm371_vm1, 1.0, %v964_v54  ;;  %v374_v61 = vsel %vm370_vm3, 1.0, %v964_v54 }
  0x95   : > { %938 = vpow2.f32 %v885_v12  ;;  %v1027_v15 = vsub.f32 %v332_v14, %v322_v7  ;;  %v1029_v16 = vsub.f32 %v332_v14, %v323_v8 }
  0x96   : > { %940 = vpow2.f32 %v886_v13 }
  0x97   : > { %v887_v17 = vmul.f32 -1.442695, %v1027_v15  ;;  %v888_v18 = vmul.f32 -1.442695, %v1029_v16  ;;  %vm373_vm2 = vcmp.gt.f32.partialorder %v1029_v16, 0.0  ;;  %vm372_vm4 = vcmp.gt.f32.partialorder %v1027_v15, 0.0 }
  0x98   : > { %v377_v60 = vsel %vm373_vm2, 1.0, %v964_v54  ;;  %v376_v62 = vsel %vm372_vm4, 1.0, %v964_v54 }
  0x99   : > { %942 = vpow2.f32 %v887_v17 }
  0x9a   : > { %944 = vpow2.f32 %v888_v18 }
  0x9f   : > { %v939_v19 = vpop.eup %938 }
  0xa0   : > { %v941_v20 = vpop.eup %940  ;;  %v350_v21 = vadd.f32 1.0, %v939_v19 }
  0xa1   : > { %v351_v22 = vadd.f32 1.0, %v941_v20 }
  0xa2   : > { %946 = vrcp.f32 %v350_v21 }
  0xa3   : > { %v943_v23 = vpop.eup %942  ;;  %948 = vrcp.f32 %v351_v22 }
  0xa4   : > { %v945_v24 = vpop.eup %944  ;;  %v352_v25 = vadd.f32 1.0, %v943_v23 }
  0xa5   : > { %v353_v26 = vadd.f32 1.0, %v945_v24 }
  0xa6   : > { %950 = vrcp.f32 %v352_v25 }
  0xa7   : > { %952 = vrcp.f32 %v353_v26 }
  0xac   : > { %v947_v42 = vpop.eup %946 }
  0xad   : > { %v949_v47 = vpop.eup %948  ;;  %v362_v48 = vmul.f32 2.0, %v947_v42 }
  0xae   : > { %v363_v49 = vmul.f32 2.0, %v949_v47 }
  0xaf   : > { %v1067_v53 = vadd.f32 -1.0, %v362_v48 }
  0xb0   : > { %v951_v58 = vpop.eup %950  ;;  %v1073_v59 = vadd.f32 -1.0, %v363_v49 }
  0xb1   : > { %v953_v63 = vpop.eup %952  ;;  %v364_v0 = vmul.f32 2.0, %v951_v58  ;;  %v378_v1 = vsub.f32 %v374_v61, %v1067_v53  ;;  %v394_v2 = vadd.f32 1.0, %v1067_v53  ;;  %v676_v3 = vsub.f32 %v672_v33, %v1067_v53 }
  0xb2   : > { %v365_v4 = vmul.f32 2.0, %v953_v63  ;;  %v379_v5 = vsub.f32 %v375_v55, %v1073_v59  ;;  %v395_v6 = vadd.f32 1.0, %v1073_v59  ;;  %v677_v7 = vsub.f32 %v673_v34, %v1073_v59 }
  0xb3   : > { %v1081_v8 = vadd.f32 -1.0, %v364_v0  ;;  %v1083_v9 = vmul.f32 %v378_v1, %v378_v1  ;;  %v398_v12 = vmul.f32 %v394_v2, %v394_v2  ;;  %v680_v13 = vmul.f32 %v676_v3, %v676_v3 }
  0xb4   : > { %v1085_v14 = vadd.f32 -1.0, %v365_v4  ;;  %v1087_v17 = vmul.f32 %v379_v5, %v379_v5  ;;  %v399_v18 = vmul.f32 %v395_v6, %v395_v6  ;;  %v681_v19 = vmul.f32 %v677_v7, %v677_v7 }
  0xb5   : > { %v380_v20 = vsub.f32 %v376_v62, %v1081_v8  ;;  %v396_v21 = vadd.f32 1.0, %v1081_v8  ;;  %v678_v22 = vsub.f32 %v674_v37, %v1081_v8  ;;  %v612_v23 = vsub.f32 %v608_v35, %v1067_v53 }
  0xb6   : > { %v381_v24 = vsub.f32 %v377_v60, %v1085_v14  ;;  %v397_v25 = vadd.f32 1.0, %v1085_v14  ;;  %v679_v26 = vsub.f32 %v675_v38, %v1085_v14  ;;  %v684_v27 = vsel %vm402_vm5, %v681_v19, 0.0 }
  0xb7   : > { %v1097_v29 = vmul.f32 %v380_v20, %v380_v20  ;;  %v400_v33 = vmul.f32 %v396_v21, %v396_v21  ;;  %v682_v34 = vmul.f32 %v678_v22, %v678_v22  ;;  %v685_v42 = vadd.f32 %v684_v27, %v680_v13 }
  0xb8   : > { %v1099_v47 = vmul.f32 %v381_v24, %v381_v24  ;;  %v401_v48 = vmul.f32 %v397_v25, %v397_v25  ;;  %v683_v37 = vmul.f32 %v679_v26, %v679_v26  ;;  %v613_v35 = vsub.f32 %v609_v36, %v1073_v59 }
  0xb9   : > { %v910_v49 = vpack.c.bf16 %v1097_v29, %v1083_v9  ;;  %v914_v54 = vpack.c.bf16 %v400_v33, %v398_v12  ;;  %v686_v38 = vadd.f32 %v685_v42, %v682_v34  ;;  %v614_v55 = vsub.f32 %v610_v39, %v1081_v8 }
  0xba   : > { %v908_v58 = vpack.c.bf16 %v1099_v47, %v1087_v17  ;;  %v912_v60 = vpack.c.bf16 %v401_v48, %v399_v18  ;;  %v687_v61 = vsel %vm402_vm5, %v683_v37, 0.0  ;;  %v615_v28 = vsub.f32 %v611_v40, %v1085_v14  ;;  %v447_v40 = vld [vmem:[%s1199_s0] sm:$0xf] }
  0xbb   : > { %v688_v36 = vadd.f32 %v687_v61, %v686_v38  ;;  %v616_v62 = vmul.f32 %v612_v23, %v612_v23  ;;  %v617_v63 = vmul.f32 %v613_v35, %v613_v35  ;;  %v618_v0 = vmul.f32 %v614_v55, %v614_v55 }
  0xbc   : > { %909 = vmatprep.subr.bf16.mxu0 %v908_v58  ;;  %913 = vmatprep.subr.bf16.mxu1 %v912_v60  ;;  %v619_v1 = vmul.f32 %v615_v28, %v615_v28  ;;  %v644_v39 = vsub.f32 %v640_v43, %v1067_v53  ;;  %v645_v2 = vsub.f32 %v641_v44, %v1073_v59  ;;  %v431_v3 = vsel %vm402_vm5, %v1085_v14, 0.0 }
  0xbd   : > { %911 = vmatpush1.bf16.msra.mxu0 %v910_v49  ;;  %915 = vmatpush1.bf16.msra.mxu1 %v914_v54  ;;  %v620_v30 = vsel %vm402_vm5, %v617_v63, 0.0  ;;  %v646_v4 = vsub.f32 %v642_v50, %v1081_v8  ;;  %v647_v31 = vsub.f32 %v643_v51, %v1085_v14  ;;  %v432_v43 = vadd.f32 %v1081_v8, %v431_v3 }
  0xbe   : > { %689 = vadd.xlane.f32.xlu0 %v688_v36  ;;  %v621_v44 = vadd.f32 %v620_v30, %v616_v62  ;;  %v623_v5 = vsel %vm402_vm5, %v619_v1, 0.0  ;;  %v648_v6 = vmul.f32 %v644_v39, %v644_v39  ;;  %v649_v7 = vmul.f32 %v645_v2, %v645_v2 }
  0xbf   : > { %v650_v12 = vmul.f32 %v646_v4, %v646_v4  ;;  %v651_v13 = vmul.f32 %v647_v31, %v647_v31  ;;  %v708_v18 = vsub.f32 %v704_v46, %v1067_v53  ;;  %v709_v50 = vsub.f32 %v705_v52, %v1073_v59 }
  0xc0   : > { %v622_v41 = vadd.f32 %v621_v44, %v618_v0  ;;  %894 = vmatmul.mubr.msk.f32.vlgmr.msra.gmra.mrb[0].mxu1 %vm448_vm6, %v447_v40  ;;  %893 = vmatmul.mubr.msk.f32.vlgmr.msra.gmra.mrb[0].mxu0 %vm448_vm6, %v447_v40  ;;  %v652_v51 = vsel %vm402_vm5, %v649_v7, 0.0  ;;  %v710_v19 = vsub.f32 %v706_v56, %v1081_v8  ;;  %v711_v20 = vsub.f32 %v707_v57, %v1085_v14 }
  0xc1   : > { %v653_v46 = vadd.f32 %v652_v51, %v648_v6  ;;  %v712_v21 = vmul.f32 %v708_v18, %v708_v18  ;;  %v713_v22 = vmul.f32 %v709_v50, %v709_v50  ;;  %v655_v24 = vsel %vm402_vm5, %v651_v13, 0.0 }
  0xc2   : > { %v624_v32 = vadd.f32 %v623_v5, %v622_v41  ;;  %433 = vadd.xlane.f32.xlu0 %v432_v43  ;;  %v714_v52 = vmul.f32 %v710_v19, %v710_v19  ;;  %v715_v25 = vmul.f32 %v711_v20, %v711_v20  ;;  %v403_v57 = vsel %vm402_vm5, %v1023_v11, inf }
  0xc3   : > { %v654_v23 = vadd.f32 %v653_v46, %v650_v12  ;;  %v716_v26 = vsel %vm402_vm5, %v713_v22, 0.0  ;;  %v404_v42 = vmin.f32 %v1021_v10, %v403_v57  ;;  %v407_v48 = vsel %vm402_vm5, %v1029_v16, inf }
  0xc4   : > { %625 = vadd.xlane.f32.xlu1 %v624_v32  ;;  %v717_v27 = vadd.f32 %v716_v26, %v712_v21  ;;  %v719_v34 = vsel %vm402_vm5, %v715_v25, 0.0  ;;  %v408_v37 = vmin.f32 %v1027_v15, %v407_v48  ;;  %v411_v35 = vsel %vm402_vm5, %v1087_v17, 0.0 }
  0xc5   : > { %v656_v33 = vadd.f32 %v655_v24, %v654_v23  ;;  %v387_v49 = vsub.f32 1.0, %v1073_v59  ;;  %v412_v54 = vadd.f32 %v411_v35, %v1083_v9  ;;  %v386_v38 = vsub.f32 1.0, %v1067_v53 }
  0xc6   : > { %v718_v56 = vadd.f32 %v717_v27, %v714_v52  ;;  %v415_v11 = vsel %vm402_vm5, %v1099_v47, 0.0  ;;  %v389_v55 = vsub.f32 1.0, %v1085_v14  ;;  %v388_v58 = vsub.f32 1.0, %v1081_v8 }
  0xc7   : > { %v391_v10 = vmul.f32 %v387_v49, %v387_v49  ;;  %v416_v16 = vadd.f32 %v415_v11, %v1097_v29  ;;  %v390_v15 = vmul.f32 %v386_v38, %v386_v38  ;;  %v427_v47 = vsel %vm402_vm5, %v1073_v59, 0.0 }
  0xc8   : > { %657 = vadd.xlane.f32.xlu1 %v656_v33  ;;  %v720_v45 = vadd.f32 %v719_v34, %v718_v56  ;;  %v393_v60 = vmul.f32 %v389_v55, %v389_v55  ;;  %v392_v9 = vmul.f32 %v388_v58, %v388_v58  ;;  %v428_v14 = vadd.f32 %v1067_v53, %v427_v47 }
  0xc9   : > { %v419_v17 = vsel %vm402_vm5, %v391_v10, 0.0 }
  0xca   : > { %v420_v61 = vadd.f32 %v419_v17, %v390_v15  ;;  %v423_v28 = vsel %vm402_vm5, %v393_v60, 0.0 }
  0xcb   : > { %v424_v36 = vadd.f32 %v423_v28, %v392_v9 }
  0xcc   : > { %721 = vadd.xlane.f32.xlu1 %v720_v45 }
  0xd0   : > { %405 = vmin.xlane.f32.xlu1 %v404_v42 }
  0xd4   : > { %409 = vmin.xlane.f32.xlu1 %v408_v37 }
  0xd8   : > { %413 = vadd.xlane.f32.xlu1 %v412_v54 }
  0xdc   : > { %417 = vadd.xlane.f32.xlu1 %v416_v16 }
  0xe0   : > { %421 = vadd.xlane.f32.xlu1 %v420_v61 }
  0xe4   : > { %425 = vadd.xlane.f32.xlu1 %v424_v36 }
  0xe8   : > { %429 = vadd.xlane.f32.xlu1 %v428_v14 }
 0x14b   : > { %v690_v29 = vpop.xlane.xlu0 %689 }
 0x14c   : > { %v691_v62 = vrot.slane %v690_v29, 4 }
 0x14e   : > { %v692_v8 = vadd.f32 %v691_v62, %v690_v29 }
 0x14f   : > { %v434_v24 = vpop.xlane.xlu0 %433 }
 0x150   : > { %v693_v39 = vrot.slane %v692_v8, 2 }
 0x151   : > { %v626_v63 = vpop.xlane.xlu1 %625 }
 0x152   : > { %v627_v0 = vrot.slane %v626_v63, 4  ;;  %v694_v43 = vadd.f32 %v693_v39, %v692_v8 }
 0x154   : > { %v628_v1 = vadd.f32 %v627_v0, %v626_v63  ;;  %v695_v13 = vrot.slane %v694_v43, 1 }
 0x155   : > { %v658_v2 = vpop.xlane.xlu1 %657 }
 0x156   : > { %v629_v3 = vrot.slane %v628_v1, 2  ;;  %v659_v30 = vrot.slane %v658_v2, 4  ;;  %v696_v20 = vadd.f32 %v695_v13, %v694_v43 }
 0x158   : > { %v660_v40 = vadd.f32 %v659_v30, %v658_v2  ;;  %v630_v4 = vadd.f32 %v629_v3, %v628_v1 }
 0x159   : > { %v722_v31 = vpop.xlane.xlu1 %721 }
 0x15a   : > { %v661_v59 = vrot.slane %v660_v40, 2  ;;  %v723_v44 = vrot.slane %v722_v31, 4  ;;  %v631_v5 = vrot.slane %v630_v4, 1 }
 0x15c   : > { %v724_v53 = vadd.f32 %v723_v44, %v722_v31  ;;  %v632_v6 = vadd.f32 %v631_v5, %v630_v4  ;;  %v662_v7 = vadd.f32 %v661_v59, %v660_v40 }
 0x15d   : > { %v406_v12 = vpop.xlane.xlu1 %405 }
 0x15e   : > { %v725_v18 = vrot.slane %v724_v53, 2  ;;  %436 = vst.msk [vmem:[%s1178_s15] sm:$0xff] %vm435_vm7, %v406_v12  ;;  %v663_v50 = vrot.slane %v662_v7, 1 }
 0x15f   : > { %916 = vpush %v632_v6 }
 0x160   : > { %v664_v41 = vadd.f32 %v663_v50, %v662_v7  ;;  %v726_v51 = vadd.f32 %v725_v18, %v724_v53 }
 0x161   : > { %v410_v19 = vpop.xlane.xlu1 %409 }
 0x162   : > { %437 = vst.msk [vmem:[%s1178_s15 + $0x8] sm:$0xff] %vm435_vm7, %v410_v19  ;;  %v727_v46 = vrot.slane %v726_v51, 1 }
 0x163   : > { %918 = vpush %v664_v41 }
 0x164   : > { %920 = vpush %v696_v20  ;;  %v728_v21 = vadd.f32 %v727_v46, %v726_v51 }
 0x165   : > { %v414_v22 = vpop.xlane.xlu1 %413 }
 0x166   : > { %439 = vst.msk [vmem:[%s1178_s15] sm:$0xff] %vm438_vm8, %v414_v22 }
 0x167   : > { %922 = vpush %v728_v21 }
 0x169   : > { %v418_v32 = vpop.xlane.xlu1 %417 }
 0x16a   : > { %440 = vst.msk [vmem:[%s1178_s15 + $0x8] sm:$0xff] %vm438_vm8, %v418_v32 }
 0x16d   : > { %v422_v52 = vpop.xlane.xlu1 %421 }
 0x16e   : > { %442 = vst.msk [vmem:[%s1178_s15] sm:$0xff] %vm441_vm9, %v422_v52 }
 0x171   : > { %v426_v23 = vpop.xlane.xlu1 %425 }
 0x172   : > { %443 = vst.msk [vmem:[%s1178_s15 + $0x8] sm:$0xff] %vm441_vm9, %v426_v23 }
 0x173   : > { %446 = vst.msk [vmem:[%s1178_s15 + $0x8] sm:$0xff] %vm444_vm10, %v434_v24 }
 0x175   : > { %v430_v25 = vpop.xlane.xlu1 %429 }
 0x176   : > { %445 = vst.msk [vmem:[%s1178_s15] sm:$0xff] %vm444_vm10, %v430_v25 }
 0x190   : > { %s917_s19 = spop %916 }
 0x191   : > { %v634_v26 = vstv %s917_s19 }
 0x192   : > { %636 = vst.msk [vmem:[%s312_s18] sm:$0x1] %vm635_vm11, %v634_v26 }
 0x193   : > { %v589_v27 = vpop.f32.mrb[0].mxu1  ;;  %v518_v33 = vpop.f32.mrb[0].mxu0 }
 0x194   : > { %s919_s26 = spop %918  ;;  %v599_v34 = vrot.slane %v589_v27, 4  ;;  %594 = vst [vmem:[%s309_s25] sm:$0xf] %v518_v33  ;;  %v591_v45 = vpop.f32.mrb[1].mxu1  ;;  %v520_v57 = vpop.f32.mrb[1].mxu0 }
 0x195   : > { %v666_v56 = vstv %s919_s26  ;;  %s921_s27 = spop %920  ;;  %v600_v48 = vrot.slane %v591_v45, 4  ;;  %596 = vst.msk [vmem:[%s309_s25 + $0x8] sm:$0xf] %vm595_vm13, %v520_v57 }
 0x196   : > { %668 = vst.msk [vmem:[%s312_s18] sm:$0x1] %vm667_vm12, %v666_v56  ;;  %v698_v42 = vstv %s921_s27  ;;  %603 = vst [vmem:[%s309_s25] sm:$0xf0] %v599_v34 }
 0x197   : > { %700 = vst.msk [vmem:[%s312_s18] sm:$0x1] %vm699_vm14, %v698_v42 }
 0x198   : > { %s923_s22 = spop %922  ;;  %605 = vst.msk [vmem:[%s309_s25 + $0x8] sm:$0xf0] %vm604_vm15, %v600_v48 }
 0x199   : > { %v730_v37 = vstv %s923_s22 }
 0x19a   : > { %732 = vst.msk [vmem:[%s312_s18] sm:$0x1] %vm731_vm0, %v730_v37 }
 0x19b PF: > { %s17_s21 = sadd.s32 1, %s960_s21  }
 0x19c   : > { %p14_p4 = scmp.ge.s32.totalorder %s17_s21, 4  }
 0x19e   :  { %16 = sbr.rel (!%p14_p4) target bundleno = 1 (0x1), region = 99 }

</bundles_post_ra>
